<compile_context>
chip_gen: v7x
topology: tpu7x:2x2x1
jax: 0.10.0
libtpu: 0.0.40
codegen_flags: <defaults>
</compile_context>

<pallas_src>
import jax
import jax.numpy as jnp
from jax.experimental import pallas as pl
from jax.experimental.pallas import tpu as pltpu


# ----------------------------------------------------------------------------
# Kernel
# ----------------------------------------------------------------------------
def small_model_kernel(x_ref, p_ref, o_ref):
    # x_ref: (81, 10)  -- the full NHWC board, rows = h*9 + w, lanes = channels.
    # p_ref: (184, 128) packed parameter slab (see pack_params):
    #   rows   0:144, lanes 0:10 : conv1 weight, row = (kh*3+kw)*16 + oc, lane = ic
    #   rows 144:160, lane  0    : conv1 bias   (16, 1) column
    #   rows 160:176, lanes 0:8  : fc1 weight laid out (in=16, out=8)
    #   rows 176:179, lanes 0:8  : fc2 weight laid out (out=3, in=8)
    #   row  179    , lanes 0:8  : fc1 bias
    #   rows 180:183, lane  0    : fc2 bias (3, 1) column
    # o_ref: (3, 1)

    # conv1 over the 3x3 spatial center window: 9 broadcast MACs on the VPU,
    # accumulating per-(oc, ic) products, then one XLU lane-reduction over ic.
    acc = p_ref[0:16, 0:10] * x_ref[30:31, :]            # (kh, kw) = (0, 0)
    for kpos in range(1, 9):                             # statically unrolled
        kh, kw = kpos // 3, kpos % 3
        r = (3 + kh) * 9 + (3 + kw)                      # row of x2d = h*9 + w
        acc = acc + p_ref[kpos * 16:(kpos + 1) * 16, 0:10] * x_ref[r:r + 1, :]

    conv_b = p_ref[144:160, 0:1]                                          # (16, 1)
    h1 = jnp.maximum(jnp.sum(acc, axis=-1, keepdims=True) + conv_b, 0.0)  # (16, 1)

    # fc1 + ReLU: weights (in=16, out=8); sublane-reduce -> row vector over lanes.
    w1 = p_ref[160:176, 0:8]                                              # (16, 8)
    b1 = p_ref[179:180, 0:8]                                              # (1, 8)
    h2 = jnp.maximum(jnp.sum(w1 * h1, axis=0, keepdims=True) + b1, 0.0)   # (1, 8)

    # fc2: weights (out=3, in=8); lane-reduce -> column vector (3, 1).
    w2 = p_ref[176:179, 0:8]                                              # (3, 8)
    b2 = p_ref[180:183, 0:1]                                              # (3, 1)
    o_ref[...] = jnp.sum(w2 * h2, axis=-1, keepdims=True) + b2            # (3, 1)


# ----------------------------------------------------------------------------
# One-time parameter preprocessing (hoisted off the per-call path)
# ----------------------------------------------------------------------------
def pack_params(params):
    """Pack all weights/biases into a single (184, 128) f32 VMEM-friendly slab."""
    conv_w, conv_b, fc1_w, fc1_b, fc2_w, fc2_b = params
    # conv weight (oc=16, ic=10, kh=3, kw=3) -> (kh, kw, oc, ic) -> (144, 10)
    # so row (kh*3+kw)*16 + oc holds the ic-vector for that tap/output channel.
    wc = jnp.transpose(conv_w, (2, 3, 0, 1)).reshape(144, 10)
    slab = jnp.zeros((184, 128), jnp.float32)
    slab = slab.at[0:144, 0:10].set(wc)
    slab = slab.at[144:160, 0].set(conv_b)      # (16,) column
    slab = slab.at[160:176, 0:8].set(fc1_w.T)   # (16, 8): in -> out
    slab = slab.at[176:179, 0:8].set(fc2_w)     # (3, 8):  out x in
    slab = slab.at[179, 0:8].set(fc1_b)
    slab = slab.at[180:183, 0].set(fc2_b)       # (3,) column
    return slab


# ----------------------------------------------------------------------------
# Forward (single compiled program: a bitcast reshape + the kernel + squeeze)
# ----------------------------------------------------------------------------
@jax.jit
def small_model_forward(x_nhwc, param_slab):
    """x_nhwc: (1, 9, 9, 10) float32. param_slab: (184, 128). Returns (3,)."""
    # Pure-view reshape (row-major bitcast): rows = h*9 + w, lanes = channels.
    x2d = x_nhwc.reshape(81, 10)

    vmem = pl.BlockSpec(memory_space=pltpu.MemorySpace.VMEM)
    out = pl.pallas_call(
        small_model_kernel,
        out_shape=jax.ShapeDtypeStruct((3, 1), jnp.float32),
        in_specs=[vmem, vmem],
        out_specs=vmem,
    )(x2d, param_slab)
    return out.reshape(3)                                        # == .squeeze()


# ----------------------------------------------------------------------------
# Reference + init
# ----------------------------------------------------------------------------
def reference_forward(x_nhwc, params):
    conv_w, conv_b, fc1_w, fc1_b, fc2_w, fc2_b = params
    hi = jax.lax.Precision.HIGHEST
    center = jnp.transpose(x_nhwc, (0, 3, 1, 2))[:, :, 3:6, 3:6]      # (1,10,3,3)
    h = jnp.einsum("nchw,ochw->no", center, conv_w, precision=hi) + conv_b
    h = jnp.maximum(h, 0.0)
    h = jnp.maximum(jnp.dot(h, fc1_w.T, precision=hi) + fc1_b, 0.0)
    h = jnp.dot(h, fc2_w.T, precision=hi) + fc2_b
    return h.reshape(3)


def init_params(key):
    """Deterministic PyTorch-like uniform init (kaiming-uniform-ish bounds)."""
    ks = jax.random.split(key, 6)

    def u(k, shape, fan_in):
        bound = 1.0 / jnp.sqrt(fan_in)
        return jax.random.uniform(k, shape, jnp.float32, -bound, bound)

    conv_w = u(ks[0], (16, 10, 3, 3), 10 * 3 * 3)   # Conv2d(10, 16, 3)
    conv_b = u(ks[1], (16,), 10 * 3 * 3)
    fc1_w = u(ks[2], (8, 16), 16)                   # Linear(16, 8)
    fc1_b = u(ks[3], (8,), 16)
    fc2_w = u(ks[4], (3, 8), 8)                     # Linear(8, 3)
    fc2_b = u(ks[5], (3,), 8)
    return conv_w, conv_b, fc1_w, fc1_b, fc2_w, fc2_b


if __name__ == "__main__":
    key = jax.random.PRNGKey(0)
    k_params, k_x = jax.random.split(key)

    params = init_params(k_params)
    slab = pack_params(params)                      # one-time preprocessing
    x = jax.random.uniform(k_x, (1, 9, 9, 10), jnp.float32)

    out = small_model_forward(x, slab)
    out = jax.block_until_ready(out)
    assert out.shape == (3,), out.shape

    ref = jax.block_until_ready(reference_forward(x, params))
    assert jnp.allclose(out, ref, rtol=1e-4, atol=1e-4), (out, ref)

    print("KERNEL_OK")
</pallas_src>

<mosaic_0001>
module attributes {stable_mosaic.version = 11 : i64} {
  func.func @small_model_kernel(%arg0: memref<81x10xf32, #tpu.memory_space<vmem>>, %arg1: memref<184x128xf32, #tpu.memory_space<vmem>>, %arg2: memref<3x1xf32, #tpu.memory_space<vmem>>) attributes {dimension_semantics = [], scalar_prefetch = 0 : i64, scratch_operands = 0 : i64, tpu.core_type = #tpu.core_type<tc>} {
    %c0 = arith.constant 0 : index
    %c0_0 = arith.constant 0 : index
    %0 = vector.load %arg1[%c0, %c0_0] : memref<184x128xf32, #tpu.memory_space<vmem>>, vector<16x10xf32>
    %c30 = arith.constant 30 : index
    %c0_1 = arith.constant 0 : index
    %1 = vector.load %arg0[%c30, %c0_1] : memref<81x10xf32, #tpu.memory_space<vmem>>, vector<1x10xf32>
    %2 = vector.broadcast %1 : vector<1x10xf32> to vector<16x10xf32>
    %3 = arith.mulf %0, %2 : vector<16x10xf32>
    %c16 = arith.constant 16 : index
    %c0_2 = arith.constant 0 : index
    %4 = vector.load %arg1[%c16, %c0_2] : memref<184x128xf32, #tpu.memory_space<vmem>>, vector<16x10xf32>
    %c31 = arith.constant 31 : index
    %c0_3 = arith.constant 0 : index
    %5 = vector.load %arg0[%c31, %c0_3] : memref<81x10xf32, #tpu.memory_space<vmem>>, vector<1x10xf32>
    %6 = vector.broadcast %5 : vector<1x10xf32> to vector<16x10xf32>
    %7 = arith.mulf %4, %6 : vector<16x10xf32>
    %8 = arith.addf %3, %7 : vector<16x10xf32>
    %c32 = arith.constant 32 : index
    %c0_4 = arith.constant 0 : index
    %9 = vector.load %arg1[%c32, %c0_4] : memref<184x128xf32, #tpu.memory_space<vmem>>, vector<16x10xf32>
    %c32_5 = arith.constant 32 : index
    %c0_6 = arith.constant 0 : index
    %10 = vector.load %arg0[%c32_5, %c0_6] : memref<81x10xf32, #tpu.memory_space<vmem>>, vector<1x10xf32>
    %11 = vector.broadcast %10 : vector<1x10xf32> to vector<16x10xf32>
    %12 = arith.mulf %9, %11 : vector<16x10xf32>
    %13 = arith.addf %8, %12 : vector<16x10xf32>
    %c48 = arith.constant 48 : index
    %c0_7 = arith.constant 0 : index
    %14 = vector.load %arg1[%c48, %c0_7] : memref<184x128xf32, #tpu.memory_space<vmem>>, vector<16x10xf32>
    %c39 = arith.constant 39 : index
    %c0_8 = arith.constant 0 : index
    %15 = vector.load %arg0[%c39, %c0_8] : memref<81x10xf32, #tpu.memory_space<vmem>>, vector<1x10xf32>
    %16 = vector.broadcast %15 : vector<1x10xf32> to vector<16x10xf32>
    %17 = arith.mulf %14, %16 : vector<16x10xf32>
    %18 = arith.addf %13, %17 : vector<16x10xf32>
    %c64 = arith.constant 64 : index
    %c0_9 = arith.constant 0 : index
    %19 = vector.load %arg1[%c64, %c0_9] : memref<184x128xf32, #tpu.memory_space<vmem>>, vector<16x10xf32>
    %c40 = arith.constant 40 : index
    %c0_10 = arith.constant 0 : index
    %20 = vector.load %arg0[%c40, %c0_10] : memref<81x10xf32, #tpu.memory_space<vmem>>, vector<1x10xf32>
    %21 = vector.broadcast %20 : vector<1x10xf32> to vector<16x10xf32>
    %22 = arith.mulf %19, %21 : vector<16x10xf32>
    %23 = arith.addf %18, %22 : vector<16x10xf32>
    %c80 = arith.constant 80 : index
    %c0_11 = arith.constant 0 : index
    %24 = vector.load %arg1[%c80, %c0_11] : memref<184x128xf32, #tpu.memory_space<vmem>>, vector<16x10xf32>
    %c41 = arith.constant 41 : index
    %c0_12 = arith.constant 0 : index
    %25 = vector.load %arg0[%c41, %c0_12] : memref<81x10xf32, #tpu.memory_space<vmem>>, vector<1x10xf32>
    %26 = vector.broadcast %25 : vector<1x10xf32> to vector<16x10xf32>
    %27 = arith.mulf %24, %26 : vector<16x10xf32>
    %28 = arith.addf %23, %27 : vector<16x10xf32>
    %c96 = arith.constant 96 : index
    %c0_13 = arith.constant 0 : index
    %29 = vector.load %arg1[%c96, %c0_13] : memref<184x128xf32, #tpu.memory_space<vmem>>, vector<16x10xf32>
    %c48_14 = arith.constant 48 : index
    %c0_15 = arith.constant 0 : index
    %30 = vector.load %arg0[%c48_14, %c0_15] : memref<81x10xf32, #tpu.memory_space<vmem>>, vector<1x10xf32>
    %31 = vector.broadcast %30 : vector<1x10xf32> to vector<16x10xf32>
    %32 = arith.mulf %29, %31 : vector<16x10xf32>
    %33 = arith.addf %28, %32 : vector<16x10xf32>
    %c112 = arith.constant 112 : index
    %c0_16 = arith.constant 0 : index
    %34 = vector.load %arg1[%c112, %c0_16] : memref<184x128xf32, #tpu.memory_space<vmem>>, vector<16x10xf32>
    %c49 = arith.constant 49 : index
    %c0_17 = arith.constant 0 : index
    %35 = vector.load %arg0[%c49, %c0_17] : memref<81x10xf32, #tpu.memory_space<vmem>>, vector<1x10xf32>
    %36 = vector.broadcast %35 : vector<1x10xf32> to vector<16x10xf32>
    %37 = arith.mulf %34, %36 : vector<16x10xf32>
    %38 = arith.addf %33, %37 : vector<16x10xf32>
    %c128 = arith.constant 128 : index
    %c0_18 = arith.constant 0 : index
    %39 = vector.load %arg1[%c128, %c0_18] : memref<184x128xf32, #tpu.memory_space<vmem>>, vector<16x10xf32>
    %c50 = arith.constant 50 : index
    %c0_19 = arith.constant 0 : index
    %40 = vector.load %arg0[%c50, %c0_19] : memref<81x10xf32, #tpu.memory_space<vmem>>, vector<1x10xf32>
    %41 = vector.broadcast %40 : vector<1x10xf32> to vector<16x10xf32>
    %42 = arith.mulf %39, %41 : vector<16x10xf32>
    %43 = arith.addf %38, %42 : vector<16x10xf32>
    %c144 = arith.constant 144 : index
    %c0_20 = arith.constant 0 : index
    %44 = vector.load %arg1[%c144, %c0_20] : memref<184x128xf32, #tpu.memory_space<vmem>>, vector<16x1xf32>
    %cst = arith.constant dense<0.000000e+00> : vector<16xf32>
    %45 = vector.multi_reduction <add>, %43, %cst [1] : vector<16x10xf32> to vector<16xf32>
    %46 = vector.shape_cast %45 : vector<16xf32> to vector<16x1xf32>
    %47 = arith.addf %46, %44 : vector<16x1xf32>
    %cst_21 = arith.constant 0.000000e+00 : f32
    %48 = vector.broadcast %cst_21 : f32 to vector<16x1xf32>
    %49 = arith.maximumf %47, %48 : vector<16x1xf32>
    %c160 = arith.constant 160 : index
    %c0_22 = arith.constant 0 : index
    %50 = vector.load %arg1[%c160, %c0_22] : memref<184x128xf32, #tpu.memory_space<vmem>>, vector<16x8xf32>
    %c179 = arith.constant 179 : index
    %c0_23 = arith.constant 0 : index
    %51 = vector.load %arg1[%c179, %c0_23] : memref<184x128xf32, #tpu.memory_space<vmem>>, vector<1x8xf32>
    %52 = vector.broadcast %49 : vector<16x1xf32> to vector<16x8xf32>
    %53 = arith.mulf %50, %52 : vector<16x8xf32>
    %cst_24 = arith.constant dense<0.000000e+00> : vector<8xf32>
    %54 = vector.multi_reduction <add>, %53, %cst_24 [0] : vector<16x8xf32> to vector<8xf32>
    %55 = vector.shape_cast %54 : vector<8xf32> to vector<1x8xf32>
    %56 = arith.addf %55, %51 : vector<1x8xf32>
    %cst_25 = arith.constant 0.000000e+00 : f32
    %57 = vector.broadcast %cst_25 : f32 to vector<1x8xf32>
    %58 = arith.maximumf %56, %57 : vector<1x8xf32>
    %c176 = arith.constant 176 : index
    %c0_26 = arith.constant 0 : index
    %59 = vector.load %arg1[%c176, %c0_26] : memref<184x128xf32, #tpu.memory_space<vmem>>, vector<3x8xf32>
    %c180 = arith.constant 180 : index
    %c0_27 = arith.constant 0 : index
    %60 = vector.load %arg1[%c180, %c0_27] : memref<184x128xf32, #tpu.memory_space<vmem>>, vector<3x1xf32>
    %61 = vector.broadcast %58 : vector<1x8xf32> to vector<3x8xf32>
    %62 = arith.mulf %59, %61 : vector<3x8xf32>
    %cst_28 = arith.constant dense<0.000000e+00> : vector<3xf32>
    %63 = vector.multi_reduction <add>, %62, %cst_28 [1] : vector<3x8xf32> to vector<3xf32>
    %64 = vector.shape_cast %63 : vector<3xf32> to vector<3x1xf32>
    %65 = arith.addf %64, %60 : vector<3x1xf32>
    %c0_29 = arith.constant 0 : index
    %c0_30 = arith.constant 0 : index
    %66 = vector.load %arg2[%c0_29, %c0_30] : memref<3x1xf32, #tpu.memory_space<vmem>>, vector<3x1xf32>
    tpu.vector_store %arg2[%c0_29, %c0_30], %65 {strides = array<i32>} : memref<3x1xf32, #tpu.memory_space<vmem>>, vector<3x1xf32>,
    return
  }
}

</mosaic_0001>

<bundles_post_ra>
// kernel: small_model_forward.1
= control target key start
LH: loop header
LB: loop body
LE: loop exit
PB: predicated region body
PF: predicated region fallthrough
CT: control target
= control target key end

     0   :  { %vm110_vm0 = vcmask 80896   ;;  %v178_v63 = vmov 0   ;;  %vm136_vm1 = vcmask 64512   ;;  %vm155_vm2 = vcmask 59392   ;;  %s299_s0 = inlined_call_operand.vmem [shape: f32[81,10], index: 0, kind: input, shape index: {}]   ;;  %s300_s1 = inlined_call_operand.vmem [shape: f32[184,128], index: 1, kind: input, shape index: {}]   ;;  %s301_s2 = inlined_call_operand.vmem [shape: f32[3,1], index: 2, kind: output, shape index: {}]  }
   0x1   :  { %v11_v0 = vld [vmem:[%s300_s1] sm:$0xff]  ;;  %v166_v1 = vld [vmem:[%s299_s0 + $0x1e] ss:$0 sm:$0xff]  ;;  %v20_v2 = vld [vmem:[%s300_s1 + $0x10] sm:$0xff]  ;;  %176 = vset.pattern.permute.xlu1 %v178_v63  ;;  %177 = vset.pattern.permute.xlu0 %v178_v63  ;;  %vm160_vm3 = vcmask 2048  }
   0x2   :  { %v18_v3 = vmul.f32 %v166_v1, %v11_v0  ;;  %v167_v4 = vld [vmem:[%s299_s0 + $0x1f] ss:$0 sm:$0xff]  ;;  %v31_v5 = vld [vmem:[%s300_s1 + $0x20] sm:$0xff]  ;;  %v42_v9 = vld [vmem:[%s300_s1 + $0x30] sm:$0xff] }
   0x3   :  { %v168_v6 = vld [vmem:[%s299_s0 + $0x20] ss:$0 sm:$0xff]  ;;  %v27_v7 = vmul.f32 %v167_v4, %v20_v2  ;;  %v169_v10 = vld [vmem:[%s299_s0 + $0x27] ss:$0 sm:$0xff]  ;;  %v170_v12 = vld [vmem:[%s299_s0 + $0x28] ss:$0 sm:$0xff] }
   0x4   :  { %v38_v8 = vmul.f32 %v168_v6, %v31_v5  ;;  %v53_v11 = vld [vmem:[%s300_s1 + $0x40] sm:$0xff]  ;;  %v49_v14 = vmul.f32 %v169_v10, %v42_v9  ;;  %v64_v15 = vld [vmem:[%s300_s1 + $0x50] sm:$0xff]  ;;  %v171_v16 = vld [vmem:[%s299_s0 + $0x29] ss:$0 sm:$0xff] }
   0x5   :  { %v29_v13 = vadd.f32 %v27_v7, %v18_v3  ;;  %v60_v18 = vmul.f32 %v170_v12, %v53_v11  ;;  %v12_v19 = vld [vmem:[%s300_s1 + $0x8] sm:$0xff]  ;;  %v21_v20 = vld [vmem:[%s300_s1 + $0x18] sm:$0xff]  ;;  %v75_v22 = vld [vmem:[%s300_s1 + $0x60] sm:$0xff]  ;;  %v71_v29 = vmul.f32 %v171_v16, %v64_v15 }
   0x6   :  { %v32_v21 = vld [vmem:[%s300_s1 + $0x28] sm:$0xff]  ;;  %v172_v23 = vld [vmem:[%s299_s0 + $0x30] ss:$0 sm:$0xff]  ;;  %v19_v24 = vmul.f32 %v166_v1, %v12_v19  ;;  %v28_v25 = vmul.f32 %v167_v4, %v21_v20  ;;  %v43_v27 = vld [vmem:[%s300_s1 + $0x38] sm:$0xff]  ;;  %v150_v20 = vlaneseq }
   0x7   :  { %v40_v17 = vadd.f32 %v38_v8, %v29_v13  ;;  %v39_v26 = vmul.f32 %v168_v6, %v32_v21  ;;  %v54_v30 = vld [vmem:[%s300_s1 + $0x48] sm:$0xff]  ;;  %v86_v31 = vld [vmem:[%s300_s1 + $0x70] sm:$0xff]  ;;  %v50_v34 = vmul.f32 %v169_v10, %v43_v27  ;;  %v82_v36 = vmul.f32 %v172_v23, %v75_v22  ;;  %v65_v37 = vld [vmem:[%s300_s1 + $0x58] sm:$0xff] }
   0x8   :  { %v173_v32 = vld [vmem:[%s299_s0 + $0x31] ss:$0 sm:$0xff]  ;;  %v30_v33 = vadd.f32 %v28_v25, %v19_v24  ;;  %v97_v38 = vld [vmem:[%s300_s1 + $0x80] sm:$0xff]  ;;  %v174_v39 = vld [vmem:[%s299_s0 + $0x32] ss:$0 sm:$0xff]  ;;  %v61_v41 = vmul.f32 %v170_v12, %v54_v30  ;;  %v72_v46 = vmul.f32 %v171_v16, %v65_v37 }
   0x9   :  { %v51_v28 = vadd.f32 %v49_v14, %v40_v17  ;;  %v93_v43 = vmul.f32 %v173_v32, %v86_v31  ;;  %v76_v44 = vld [vmem:[%s300_s1 + $0x68] sm:$0xff]  ;;  %v104_v48 = vmul.f32 %v174_v39, %v97_v38  ;;  %v87_v49 = vld [vmem:[%s300_s1 + $0x78] sm:$0xff]  ;;  %v108_v0 = vld [vmem:[%s300_s1 + $0x90] sm:$0xff] }
   0xa   :  { %v41_v40 = vadd.f32 %v39_v26, %v30_v33  ;;  %v83_v51 = vmul.f32 %v172_v23, %v76_v44  ;;  %v98_v53 = vld [vmem:[%s300_s1 + $0x88] sm:$0xff]  ;;  %v94_v55 = vmul.f32 %v173_v32, %v87_v49  ;;  %v109_v4 = vld [vmem:[%s300_s1 + $0x98] sm:$0xff]  ;;  %v121_v9 = vld [vmem:[%s300_s1 + $0xa0] sm:$0xff]  ;;  %v151_v23 = vshrl.u32 %v150_v20, 7 }
   0xb   :  { %v62_v35 = vadd.f32 %v60_v18, %v51_v28  ;;  %v105_v58 = vmul.f32 %v174_v39, %v98_v53  ;;  %v122_v10 = vld [vmem:[%s300_s1 + $0xa8] sm:$0xff]  ;;  %v123_v24 = vld [vmem:[%s300_s1 + $0xb3] sm:$0x1]  ;;  %v149_v33 = vld [vmem:[%s300_s1 + $0xb4] sm:$0x7] }
   0xc   :  { %v52_v45 = vadd.f32 %v50_v34, %v41_v40  ;;  %v152_v27 = vsub.s32 0, %v151_v23 }
   0xd   :  { %v73_v42 = vadd.f32 %v71_v29, %v62_v35  ;;  %v148_v29 = vld [vmem:[%s300_s1 + $0xb0] sm:$0x7] }
   0xe   :  { %v63_v50 = vadd.f32 %v61_v41, %v52_v45 }
   0xf   :  { %v84_v47 = vadd.f32 %v82_v36, %v73_v42 }
  0x10   :  { %v74_v54 = vadd.f32 %v72_v46, %v63_v50 }
  0x11   :  { %v95_v52 = vadd.f32 %v93_v43, %v84_v47 }
  0x12   :  { %v85_v57 = vadd.f32 %v83_v51, %v74_v54 }
  0x13   :  { %v106_v56 = vadd.f32 %v104_v48, %v95_v52 }
  0x14   :  { %v96_v60 = vadd.f32 %v94_v55, %v85_v57 }
  0x15   :  { %v111_v59 = vsel %vm110_vm0, %v106_v56, 0.0 }
  0x16   :  { %112 = vadd.xlane.f32.xlu0 %v111_v59  ;;  %v107_v61 = vadd.f32 %v105_v58, %v96_v60 }
  0x18   :  { %v114_v62 = vsel %vm110_vm0, %v107_v61, 0.0 }
  0x1a   :  { %115 = vadd.xlane.f32.xlu0 %v114_v62 }
  0xa3   :  { %v113_v1 = vpop.xlane.xlu0 %112 }
  0xa4   :  { %v117_v2 = vadd.f32 %v113_v1, %v108_v0 }
  0xa6   :  { %v119_v3 = vmax.f32 %v117_v2, 0.0 }
  0xa7   :  { %v116_v5 = vpop.xlane.xlu0 %115 }
  0xa8   :  { %126 = vperm.xlu1 %176, %v119_v3   ;;  %v118_v6 = vadd.f32 %v116_v5, %v109_v4 }
  0xaa   :  { %v120_v7 = vmax.f32 %v118_v6, 0.0 }
  0xac   :  { %131 = vperm.xlu1 %176, %v120_v7  }
 0x127   :  { %v127_v8 = vpop.permute.xlu1 %126 }
 0x128   :  { %v134_v11 = vmul.f32 %v127_v8, %v121_v9 }
 0x12a   :  { %v137_v14 = vsel %vm136_vm1, %v134_v11, 0.0 }
 0x12b   :  { %v132_v12 = vpop.permute.xlu1 %131 }
 0x12c   :  { %v135_v13 = vmul.f32 %v132_v12, %v122_v10 }
 0x12e   :  { %v138_v15 = vsel %vm136_vm1, %v135_v13, 0.0 }
 0x12f   :  { %v139_v16 = vadd.f32 %v138_v15, %v137_v14 }
 0x131   :  { %v140_v17 = vrot.slane %v139_v16, 4 }
 0x133   :  { %v141_v18 = vadd.f32 %v140_v17, %v139_v16 }
 0x135   :  { %v142_v19 = vrot.slane %v141_v18, 2 }
 0x137   :  { %v143_v21 = vadd.f32 %v142_v19, %v141_v18 }
 0x139   :  { %v144_v22 = vrot.slane %v143_v21, 1 }
 0x13b   :  { %v145_v25 = vadd.f32 %v144_v22, %v143_v21 }
 0x13d   :  { %v146_v26 = vadd.f32 %v145_v25, %v123_v24 }
 0x13f   :  { %v147_v28 = vmax.f32 %v146_v26, 0.0 }
 0x141   :  { %v153_v30 = vrot.slane %v147_v28, %v152_v27 }
 0x143   :  { %v154_v31 = vmul.f32 %v153_v30, %v148_v29 }
 0x145   :  { %v156_v32 = vsel %vm155_vm2, %v154_v31, 0.0 }
 0x146   :  { %157 = vadd.xlane.f32.xlu0 %v156_v32 }
 0x1d3   :  { %v158_v34 = vpop.xlane.xlu0 %157 }
 0x1d4   :  { %v159_v35 = vadd.f32 %v158_v34, %v149_v33 }
 0x1d6   :  { %161 = vst.msk [vmem:[%s301_s2] sm:$0x7] %vm160_vm3, %v159_v35 }

</bundles_post_ra>
